<compile_context>
chip_gen: v7x
topology: tpu7x:2x2x1
jax: 0.10.0
libtpu: 0.0.40
codegen_flags: <defaults>
</compile_context>

<pallas_src>
import functools

import jax
import jax.numpy as jnp
from jax.experimental import pallas as pl
from jax.experimental.pallas import tpu as pltpu


# ----------------------------- Pallas kernel --------------------------------

def _matmul_bias_act_kernel(a_ref, b_ref, bias_ref, o_ref, acc_ref, *,
                            apply_relu):
    """One (tm, tn) output tile of  A @ B + bias  with optional ReLU.

    Grid = (M_tiles, N_tiles, K_tiles); K is the reduction axis (last,
    'arbitrary').  acc_ref is a persistent f32 VMEM accumulator.
    """
    k = pl.program_id(2)

    @pl.when(k == 0)
    def _init():
        acc_ref[...] = jnp.zeros_like(acc_ref)

    acc_ref[...] += jnp.dot(a_ref[...], b_ref[...],
                            preferred_element_type=jnp.float32)

    @pl.when(k == pl.num_programs(2) - 1)
    def _finalize():
        out = acc_ref[...] + bias_ref[pl.ds(0, 1), :]   # (1, tn) broadcast
        if apply_relu:
            out = jnp.maximum(out, 0.0)
        o_ref[...] = out.astype(o_ref.dtype)


# ------------------------------ Pallas wrapper -------------------------------

def _round_up(x, m):
    return ((x + m - 1) // m) * m


def _pick_tile(padded_dim, prefs):
    for p in prefs:
        if padded_dim % p == 0:
            return p
    return 128  # padded_dim is always a multiple of 128


def matmul_bias_act(a, b, bias=None, apply_relu=False):
    """C = A @ B (+ bias) (+ ReLU), tiled Pallas matmul.

    * A [M, K], B [K, N2] are cast to bf16 (MXU inputs), accumulation is f32.
    * Everything is zero-padded to 128-multiples so all loads/stores are
      lane-dense full (8,128) tiles; result is sliced back to [M, N2] f32.
    """
    M, K = a.shape
    K2, N = b.shape
    assert K == K2, (a.shape, b.shape)

    a = a.astype(jnp.bfloat16)
    b = b.astype(jnp.bfloat16)

    Mp = _round_up(M, 128)
    Kp = _round_up(K, 128)
    Np = _round_up(N, 128)

    tm = _pick_tile(Mp, (256, 128))
    tn = _pick_tile(Np, (256, 128))
    tk = _pick_tile(Kp, (512, 256, 128))

    a_p = jnp.zeros((Mp, Kp), jnp.bfloat16).at[:M, :K].set(a)
    b_p = jnp.zeros((Kp, Np), jnp.bfloat16).at[:K, :N].set(b)
    if bias is None:
        bias = jnp.zeros((N,), jnp.float32)
    bias_p = jnp.zeros((8, Np), jnp.float32).at[0, :N].set(
        bias.astype(jnp.float32))

    grid = (Mp // tm, Np // tn, Kp // tk)
    kernel = functools.partial(_matmul_bias_act_kernel, apply_relu=apply_relu)

    out_p = pl.pallas_call(
        kernel,
        out_shape=jax.ShapeDtypeStruct((Mp, Np), jnp.float32),
        grid_spec=pltpu.PrefetchScalarGridSpec(
            num_scalar_prefetch=0,
            grid=grid,
            in_specs=[
                pl.BlockSpec((tm, tk), lambda i, j, k: (i, k)),   # A
                pl.BlockSpec((tk, tn), lambda i, j, k: (k, j)),   # B
                pl.BlockSpec((8, tn), lambda i, j, k: (0, j)),    # bias (padded)
            ],
            out_specs=pl.BlockSpec((tm, tn), lambda i, j, k: (i, j)),
            scratch_shapes=[pltpu.VMEM((tm, tn), jnp.float32)],
        ),
        compiler_params=pltpu.CompilerParams(
            dimension_semantics=("parallel", "parallel", "arbitrary"),
            vmem_limit_bytes=32 * 1024 * 1024,
        ),
    )(a_p, b_p, bias_p)

    return out_p[:M, :N]


# ------------------------------- Glue (JAX) ---------------------------------

def gcn_norm_dense(edge_index, edge_weight, num_nodes):
    """PyG gcn_norm (add_self_loops=True) materialized as dense A_hat [N, N].

    A_hat[i, j] = deg^-1/2[j] * w_{j->i} * deg^-1/2[i]; computed in f32.
    """
    row = edge_index[0]
    col = edge_index[1]
    ew = edge_weight.reshape(-1).astype(jnp.float32)

    loop = jnp.arange(num_nodes, dtype=row.dtype)
    row = jnp.concatenate([row, loop])
    col = jnp.concatenate([col, loop])
    ew = jnp.concatenate([ew, jnp.ones((num_nodes,), dtype=jnp.float32)])

    deg = jnp.zeros((num_nodes,), dtype=jnp.float32).at[col].add(ew)
    deg_inv_sqrt = jnp.where(deg > 0, jax.lax.rsqrt(deg), 0.0)
    norm = deg_inv_sqrt[row] * ew * deg_inv_sqrt[col]

    # aggregation target = col, source = row
    a_hat = jnp.zeros((num_nodes, num_nodes), jnp.float32).at[col, row].add(norm)
    return a_hat


def gcn_layer_pallas(a_hat, x, w, b, apply_relu):
    """One GCNConv layer: A_hat @ (x @ W^T) + b, optional ReLU.

    Uses the cheaper association: aggregate first when F_in <= F_out.
    """
    f_out, f_in = w.shape
    if f_in <= f_out:
        z = matmul_bias_act(a_hat, x)                               # [N, F_in]
        y = matmul_bias_act(z, w.T, bias=b, apply_relu=apply_relu)  # [N, F_out]
    else:
        h = matmul_bias_act(x, w.T)                                 # [N, F_out]
        y = matmul_bias_act(a_hat, h, bias=b, apply_relu=apply_relu)
    return y


def layer_agg_edge_forward(params, x, edge_index, edge_attr, num_layers=2):
    """Forward of Layer_AGG_Edge (eval mode)."""
    if edge_attr.ndim == 1:
        edge_attr = edge_attr[:, None]  # mirrors edge_attr.unsqueeze(1)
    n = x.shape[0]
    a_hat = gcn_norm_dense(edge_index, edge_attr, n)
    for i in range(num_layers):
        w, b = params[i]
        apply_relu = i != num_layers - 1
        x = gcn_layer_pallas(a_hat, x, w, b, apply_relu)
        # dropout: identity in eval mode
    return x


def init_params(key, in_feat, out_feat, num_layers=2):
    """Glorot-uniform weights [out, in]; small random bias (to exercise path)."""
    params = []
    for i in range(num_layers):
        key, kw, kb = jax.random.split(key, 3)
        fin = in_feat if i == 0 else out_feat
        limit = (6.0 / (fin + out_feat)) ** 0.5
        w = jax.random.uniform(kw, (out_feat, fin), minval=-limit, maxval=limit,
                               dtype=jnp.float32)
        b = jax.random.uniform(kb, (out_feat,), minval=-0.5, maxval=0.5,
                               dtype=jnp.float32)
        params.append((w, b))
    return params


# ------------------------------- References ----------------------------------

def _reference_forward_f32(params, x, edge_index, edge_attr, num_layers=2):
    """Pure-f32 JAX reference (module semantics)."""
    if edge_attr.ndim == 1:
        edge_attr = edge_attr[:, None]
    a_hat = gcn_norm_dense(edge_index, edge_attr, x.shape[0])
    for i in range(num_layers):
        w, b = params[i]
        x = a_hat @ (x @ w.T) + b[None, :]
        if i != num_layers - 1:
            x = jnp.maximum(x, 0.0)
    return x


def _reference_forward_matched(params, x, edge_index, edge_attr, num_layers=2):
    """Reference mirroring the kernel's bf16-input / f32-accumulate matmuls
    and its association order — checks the Pallas plumbing tightly."""
    def mm(a, b):
        return jnp.dot(a.astype(jnp.bfloat16), b.astype(jnp.bfloat16),
                       preferred_element_type=jnp.float32)

    if edge_attr.ndim == 1:
        edge_attr = edge_attr[:, None]
    a_hat = gcn_norm_dense(edge_index, edge_attr, x.shape[0])
    for i in range(num_layers):
        w, b = params[i]
        f_out, f_in = w.shape
        if f_in <= f_out:
            y = mm(mm(a_hat, x), w.T) + b[None, :]
        else:
            y = mm(a_hat, mm(x, w.T)) + b[None, :]
        if i != num_layers - 1:
            y = jnp.maximum(y, 0.0)
        x = y
    return x


# --------------------------------- Main --------------------------------------

if __name__ == "__main__":
    key = jax.random.PRNGKey(0)
    k_x, k_ei, k_ea, k_p = jax.random.split(key, 4)

    N = 16          # number of graph nodes
    E = 48          # number of edges
    IN_FEAT = 16
    OUT_FEAT = 32
    NUM_LAYERS = 2

    x = jax.random.normal(k_x, (N, IN_FEAT), dtype=jnp.float32)
    edge_index = jax.random.randint(k_ei, (2, E), 0, N, dtype=jnp.int32)
    edge_attr = jax.random.uniform(k_ea, (E,), dtype=jnp.float32)  # per-edge weight

    params = init_params(k_p, IN_FEAT, OUT_FEAT, NUM_LAYERS)

    out = layer_agg_edge_forward(params, x, edge_index, edge_attr, NUM_LAYERS)
    out = jax.block_until_ready(out)
    assert out.shape == (N, OUT_FEAT)
    assert bool(jnp.all(jnp.isfinite(out)))

    # Tight check vs. a dtype/association-matched reference (plumbing check).
    ref_m = _reference_forward_matched(params, x, edge_index, edge_attr, NUM_LAYERS)
    assert jnp.allclose(out, ref_m, atol=2e-3, rtol=2e-3), \
        float(jnp.max(jnp.abs(out - ref_m)))

    # Loose check vs. the pure-f32 module semantics (bf16 MXU inputs).
    ref_f = _reference_forward_f32(params, x, edge_index, edge_attr, NUM_LAYERS)
    assert jnp.allclose(out, ref_f, atol=5e-2, rtol=5e-2), \
        float(jnp.max(jnp.abs(out - ref_f)))

    print("KERNEL_OK")
</pallas_src>

<mosaic_0001>
module attributes {stable_mosaic.version = 11 : i64} {
  func.func @_matmul_bias_act_kernel(%arg0: i32, %arg1: i32, %arg2: i32, %arg3: memref<128x128xbf16, #tpu.memory_space<vmem>>, %arg4: memref<128x128xbf16, #tpu.memory_space<vmem>>, %arg5: memref<8x128xf32, #tpu.memory_space<vmem>>, %arg6: memref<128x128xf32, #tpu.memory_space<vmem>>, %arg7: memref<128x128xf32, #tpu.memory_space<vmem>>) attributes {dimension_semantics = [#tpu.dimension_semantics<parallel>, #tpu.dimension_semantics<parallel>, #tpu.dimension_semantics<arbitrary>], iteration_bounds = array<i64: 1, 1, 1>, scalar_prefetch = 0 : i64, scratch_operands = 1 : i64, tpu.core_type = #tpu.core_type<tc>, window_params = [{transform_indices = @transform_0, window_bounds = array<i64: 128, 128>}, {transform_indices = @transform_1, window_bounds = array<i64: 128, 128>}, {transform_indices = @transform_2, window_bounds = array<i64: 8, 128>}, {transform_indices = @transform_3, window_bounds = array<i64: 128, 128>}]} {
    %c0_i32 = arith.constant 0 : i32
    %0 = arith.cmpi eq, %arg2, %c0_i32 : i32
    %1 = arith.extui %0 : i1 to i32
    %c0_i32_0 = arith.constant 0 : i32
    %2 = arith.cmpi ne, %1, %c0_i32_0 : i32
    scf.if %2 {
      %cst_10 = arith.constant 0.000000e+00 : f32
      %12 = vector.broadcast %cst_10 : f32 to vector<128x128xf32>
      %c0_11 = arith.constant 0 : index
      %c0_12 = arith.constant 0 : index
      %13 = vector.load %arg7[%c0_11, %c0_12] : memref<128x128xf32, #tpu.memory_space<vmem>>, vector<128x128xf32>
      tpu.vector_store %arg7[%c0_11, %c0_12], %12 {strides = array<i32>} : memref<128x128xf32, #tpu.memory_space<vmem>>, vector<128x128xf32>,
    } else {
    }
    %c0 = arith.constant 0 : index
    %c0_1 = arith.constant 0 : index
    %3 = vector.load %arg7[%c0, %c0_1] : memref<128x128xf32, #tpu.memory_space<vmem>>, vector<128x128xf32>
    %c0_2 = arith.constant 0 : index
    %c0_3 = arith.constant 0 : index
    %4 = vector.load %arg3[%c0_2, %c0_3] : memref<128x128xbf16, #tpu.memory_space<vmem>>, vector<128x128xbf16>
    %c0_4 = arith.constant 0 : index
    %c0_5 = arith.constant 0 : index
    %5 = vector.load %arg4[%c0_4, %c0_5] : memref<128x128xbf16, #tpu.memory_space<vmem>>, vector<128x128xbf16>
    %cst = arith.constant dense<0.000000e+00> : vector<128x128xf32>
    %6 = tpu.matmul %4, %5, %cst {dimension_numbers = #tpu.dot_dimension_numbers<[1], [0], [0], [1], [0, 0, 1, 1], [], []>} : vector<128x128xbf16>, vector<128x128xbf16>, vector<128x128xf32> -> vector<128x128xf32>
    %7 = arith.addf %3, %6 : vector<128x128xf32>
    %c0_6 = arith.constant 0 : index
    %c0_7 = arith.constant 0 : index
    %8 = vector.load %arg7[%c0_6, %c0_7] : memref<128x128xf32, #tpu.memory_space<vmem>>, vector<128x128xf32>
    tpu.vector_store %arg7[%c0_6, %c0_7], %7 {strides = array<i32>} : memref<128x128xf32, #tpu.memory_space<vmem>>, vector<128x128xf32>,
    %c0_i32_8 = arith.constant 0 : i32
    %9 = arith.cmpi eq, %arg2, %c0_i32_8 : i32
    %10 = arith.extui %9 : i1 to i32
    %c0_i32_9 = arith.constant 0 : i32
    %11 = arith.cmpi ne, %10, %c0_i32_9 : i32
    scf.if %11 {
      %c0_10 = arith.constant 0 : index
      %c0_11 = arith.constant 0 : index
      %12 = vector.load %arg7[%c0_10, %c0_11] : memref<128x128xf32, #tpu.memory_space<vmem>>, vector<128x128xf32>
      %c0_12 = arith.constant 0 : index
      %c0_13 = arith.constant 0 : index
      %13 = vector.load %arg5[%c0_12, %c0_13] : memref<8x128xf32, #tpu.memory_space<vmem>>, vector<1x128xf32>
      %14 = vector.broadcast %13 : vector<1x128xf32> to vector<128x128xf32>
      %15 = arith.addf %12, %14 : vector<128x128xf32>
      %c0_14 = arith.constant 0 : index
      %c0_15 = arith.constant 0 : index
      %16 = vector.load %arg6[%c0_14, %c0_15] : memref<128x128xf32, #tpu.memory_space<vmem>>, vector<128x128xf32>
      tpu.vector_store %arg6[%c0_14, %c0_15], %15 {strides = array<i32>} : memref<128x128xf32, #tpu.memory_space<vmem>>, vector<128x128xf32>,
    } else {
    }
    return
  }
  func.func @transform_0(%arg0: i32, %arg1: i32, %arg2: i32) -> (i32, i32) {
    %c0_i32 = arith.constant 0 : i32
    return %arg0, %arg2 : i32, i32
  }
  func.func @transform_1(%arg0: i32, %arg1: i32, %arg2: i32) -> (i32, i32) {
    %c0_i32 = arith.constant 0 : i32
    return %arg2, %arg1 : i32, i32
  }
  func.func @transform_2(%arg0: i32, %arg1: i32, %arg2: i32) -> (i32, i32) {
    %c0_i32 = arith.constant 0 : i32
    %c0_i32_0 = arith.constant 0 : i32
    return %c0_i32, %arg1 : i32, i32
  }
  func.func @transform_3(%arg0: i32, %arg1: i32, %arg2: i32) -> (i32, i32) {
    %c0_i32 = arith.constant 0 : i32
    return %arg0, %arg1 : i32, i32
  }
}

</mosaic_0001>

<bundles_post_ra>
// kernel: tpu_custom_call.1
= control target key start
LH: loop header
LB: loop body
LE: loop exit
PB: predicated region body
PF: predicated region fallthrough
CT: control target
= control target key end

     0   :  { %8 = vsyncpa [#allocation4], 0  ;;  %s704_s0 = inlined_call_operand.hbm [shape: bf16[128,128], index: 0, kind: input, shape index: {}]   ;;  %s705_s1 = inlined_call_operand.hbm [shape: bf16[128,128], index: 1, kind: input, shape index: {}]   ;;  %s706_s2 = inlined_call_operand.hbm [shape: f32[8,128], index: 2, kind: input, shape index: {}]   ;;  %s707_s3 = inlined_call_operand.hbm [shape: f32[128,128], index: 3, kind: output, shape index: {}]  }
   0x1   :  { %9 = vsyncpa [#allocation7], 0 }
   0x2   :  { %10 = vsyncpa [#allocation5], 0  ;;  %s621_s12 = smov [#allocation6]   ;;  %s622_s14 = smov [#allocation3]  }
   0x3   :  { %s28_s13 = sshll.u32 %s621_s12, 4  ;;  %s16_s15 = sshll.u32 %s622_s14, 4  ;;  %s29_s13 = int_to_ptr.vmem [resolvable:$true] %s28_s13  ;;  %s649_s15 = int_to_ptr.vmem [resolvable:$true] %s16_s15 }
   0x4   :  { %s527_s18 = scalar_lea.hbm %s705_s1, 1024 }
   0x5   :  { %p528_p0 = scmp.ne.s32.totalorder %s705_s1, %s527_s18  ;;  %p531_p1 = scmp.lt.u32.totalorder %s527_s18, %s705_s1 }
   0x7   :  { %p533_p2 = pnand %p531_p1, %p528_p0 }
   0x9   :  { %536 = shalt.err (!%p533_p2)
}
   0xa   :  { %s537_s23 = scalar_lea.vmem %s29_s13, 1024  ;;  %p542_p4 = scmp.lt.s32.totalorder %s29_s13, %s29_s13 }
   0xb   :  { %p538_p3 = scmp.ne.s32.totalorder %s29_s13, %s537_s23  ;;  %p543_p5 = scmp.lt.s32.totalorder %s537_s23, %s537_s23 }
   0xd   :  { %p544_p6 = por %p543_p5, %p542_p4 }
   0xf   :  { %p545_p7 = pnand %p544_p6, %p538_p3 }
  0x11   :  { %548 = shalt.err (!%p545_p7)
}
  0x12   :  { %s623_s24 = smov 64   ;;  %s624_s25 = smov 4  }
  0x13   :  { %34 = dma.hbm_to_vmem [thread:$0]  %s705_s1, 1024, %s29_s13, [#allocation7], %s623_s24, %s623_s24, %s624_s25  }
  0x14   :  { %s549_s30 = scalar_lea.hbm %s704_s0, 1024 }
  0x15   :  { %p550_p8 = scmp.ne.s32.totalorder %s704_s0, %s549_s30  ;;  %p553_p9 = scmp.lt.u32.totalorder %s549_s30, %s704_s0 }
  0x17   :  { %p555_p10 = pnand %p553_p9, %p550_p8 }
  0x19   :  { %558 = shalt.err (!%p555_p10)
}
  0x1a   :  { %s559_s8 = scalar_lea.vmem %s649_s15, 1024  ;;  %p564_p12 = scmp.lt.s32.totalorder %s649_s15, %s649_s15 }
  0x1b   :  { %p560_p11 = scmp.ne.s32.totalorder %s649_s15, %s559_s8  ;;  %p565_p13 = scmp.lt.s32.totalorder %s559_s8, %s559_s8 }
  0x1d   :  { %p566_p0 = por %p565_p13, %p564_p12 }
  0x1f   :  { %p567_p1 = pnand %p566_p0, %p560_p11 }
  0x21   :  { %570 = shalt.err (!%p567_p1)
}
  0x22   :  { %22 = dma.hbm_to_vmem [thread:$0]  %s704_s0, 1024, %s649_s15, [#allocation4], %s623_s24, %s623_s24, %s624_s25  }
  0x23   :  { %s625_s10 = smov [#allocation8]   ;;  %s571_s14 = scalar_lea.hbm %s706_s2, 128 }
  0x24   :  { %s41_s11 = sshll.u32 %s625_s10, 4  ;;  %p572_p2 = scmp.ne.s32.totalorder %s706_s2, %s571_s14  ;;  %s42_s11 = int_to_ptr.vmem [resolvable:$true] %s41_s11 }
  0x25   :  { %p575_p3 = scmp.lt.u32.totalorder %s571_s14, %s706_s2 }
  0x27   :  { %p577_p4 = pnand %p575_p3, %p572_p2 }
  0x29   :  { %580 = shalt.err (!%p577_p4)
}
  0x2a   :  { %s581_s20 = scalar_lea.vmem %s42_s11, 128  ;;  %p586_p6 = scmp.lt.s32.totalorder %s42_s11, %s42_s11 }
  0x2b   :  { %p582_p5 = scmp.ne.s32.totalorder %s42_s11, %s581_s20  ;;  %p587_p7 = scmp.lt.s32.totalorder %s581_s20, %s581_s20 }
  0x2d   :  { %p588_p8 = por %p587_p7, %p586_p6 }
  0x2f   :  { %p589_p9 = pnand %p588_p8, %p582_p5 }
  0x31   :  { %592 = shalt.err (!%p589_p9)
}
  0x32   :  { %44 = dma.hbm_to_vmem [thread:$0]  %s706_s2, 128, %s42_s11, [#allocation7]  }
  0x33   :  { %615 = dma.done.wait [#allocation4], 1024  }
  0x34   :  { %616 = vsyncadd [#allocation4], 4294966272 }
  0x35   :  { %617 = dma.done.wait [#allocation7], 1152  }
  0x36   :  { %618 = vsyncadd [#allocation7], 4294966144  ;;  %v511_v0 = vld [vmem:[#allocation6] sm:$0xff]   ;;  %v512_v1 = vld [vmem:[#allocation6 + $0x8] sm:$0xff]   ;;  %s626_s2 = smov [#allocation9]  }
  0x37   :  { %455 = vmatprep.subr.bf16.mxu0 %v511_v0  ;;  %487 = vmatprep.subr.bf16.mxu1 %v511_v0  ;;  %v513_v2 = vld [vmem:[#allocation6 + $0x10] sm:$0xff]   ;;  %v514_v3 = vld [vmem:[#allocation6 + $0x18] sm:$0xff]   ;;  %v519_v4 = vld [vmem:[#allocation3] sm:$0xff]   ;;  %s409_s21 = sshll.u32 %s626_s2, 4  ;;  %s410_s21 = int_to_ptr.vmem [resolvable:$true] %s409_s21 }
  0x38   :  { %456 = vmatpush3.bf16.msra.mxu0 %v511_v0  ;;  %495 = vmatpush3.bf16.msra.mxu1 %v511_v0  ;;  %v520_v5 = vld [vmem:[#allocation3 + $0x20] sm:$0xff]   ;;  %v516_v7 = vld [vmem:[#allocation6 + $0x28] sm:$0xff]   ;;  %v517_v8 = vld [vmem:[#allocation6 + $0x30] sm:$0xff]   ;;  %s593_s22 = scalar_lea.vmem %s410_s21, 2048  ;;  %p598_p11 = scmp.lt.s32.totalorder %s410_s21, %s410_s21 }
  0x39   :  { %457 = vmatprep.subr.bf16.mxu0 %v512_v1  ;;  %488 = vmatprep.subr.bf16.mxu1 %v512_v1  ;;  %v515_v6 = vld [vmem:[#allocation6 + $0x20] sm:$0xff]   ;;  %v518_v9 = vld [vmem:[#allocation6 + $0x38] sm:$0xff]   ;;  %v521_v10 = vld [vmem:[#allocation3 + $0x8] sm:$0xff]   ;;  %p594_p10 = scmp.ne.s32.totalorder %s410_s21, %s593_s22  ;;  %p599_p12 = scmp.lt.s32.totalorder %s593_s22, %s593_s22 }
  0x3a   :  { %471 = vmatprep.mubr.bf16.mxu0 %v519_v4  ;;  %479 = vmatprep.mubr.bf16.mxu1 %v520_v5  ;;  %v522_v11 = vld [vmem:[#allocation3 + $0x28] sm:$0xff]   ;;  %v523_v12 = vld [vmem:[#allocation3 + $0x10] sm:$0xff]   ;;  %v525_v14 = vld [vmem:[#allocation3 + $0x18] sm:$0xff]  }
  0x3b   :  { %v524_v13 = vld [vmem:[#allocation3 + $0x30] sm:$0xff]   ;;  %v526_v15 = vld [vmem:[#allocation3 + $0x38] sm:$0xff]   ;;  %v438_v16 = vld [vmem:[#allocation8] ss:$0 sm:$0xff]  ;;  %p600_p13 = por %p599_p12, %p598_p11 }
  0x3c   :  { %458 = vmatpush3.bf16.msra.mxu0 %v512_v1  ;;  %496 = vmatpush3.bf16.msra.mxu1 %v512_v1 }
  0x3d   :  { %459 = vmatprep.subr.bf16.mxu0 %v513_v2  ;;  %489 = vmatprep.subr.bf16.mxu1 %v513_v2  ;;  %p601_p0 = pnand %p600_p13, %p594_p10 }
  0x40   :  { %460 = vmatpush3.bf16.msra.mxu0 %v513_v2  ;;  %497 = vmatpush3.bf16.msra.mxu1 %v513_v2 }
  0x41   :  { %461 = vmatprep.subr.bf16.mxu0 %v514_v3  ;;  %490 = vmatprep.subr.bf16.mxu1 %v514_v3 }
  0x44   :  { %462 = vmatpush3.bf16.msra.mxu0 %v514_v3  ;;  %498 = vmatpush3.bf16.msra.mxu1 %v514_v3 }
  0x45   :  { %463 = vmatprep.subr.bf16.mxu0 %v515_v6  ;;  %491 = vmatprep.subr.bf16.mxu1 %v515_v6 }
  0x48   :  { %464 = vmatpush3.bf16.msra.mxu0 %v515_v6  ;;  %499 = vmatpush3.bf16.msra.mxu1 %v515_v6 }
  0x49   :  { %465 = vmatprep.subr.bf16.mxu0 %v516_v7  ;;  %492 = vmatprep.subr.bf16.mxu1 %v516_v7 }
  0x4c   :  { %466 = vmatpush3.bf16.msra.mxu0 %v516_v7  ;;  %500 = vmatpush3.bf16.msra.mxu1 %v516_v7 }
  0x4d   :  { %467 = vmatprep.subr.bf16.mxu0 %v517_v8  ;;  %493 = vmatprep.subr.bf16.mxu1 %v517_v8 }
  0x50   :  { %468 = vmatpush3.bf16.msra.mxu0 %v517_v8  ;;  %501 = vmatpush3.bf16.msra.mxu1 %v517_v8 }
  0x51   :  { %469 = vmatprep.subr.bf16.mxu0 %v518_v9  ;;  %494 = vmatprep.subr.bf16.mxu1 %v518_v9 }
  0x54   :  { %470 = vmatpush3.bf16.msra.mxu0 %v518_v9  ;;  %502 = vmatpush3.bf16.msra.mxu1 %v518_v9 }
  0x57   :  { %472 = vmatmul.mubr.bf16.vlgmr.msra.gmra.mrb[0].mxu0 %v521_v10  ;;  %480 = vmatmul.mubr.bf16.vlgmr.msra.gmra.mrb[0].mxu1 %v522_v11 }
  0x58   :  { %475 = vmatprep.mubr.bf16.mxu0 %v523_v12  ;;  %483 = vmatprep.mubr.bf16.mxu1 %v524_v13 }
  0x5f   :  { %476 = vmatmul.mubr.bf16.gmra.mrb[4].mxu0 %v525_v14  ;;  %484 = vmatmul.mubr.bf16.gmra.mrb[4].mxu1 %v526_v15 }
 0x12a   :  { %v473_v17 = vpop.f32.mrb[0].mxu0  ;;  %v481_v18 = vpop.f32.mrb[0].mxu1 }
 0x12b   :  { %v374_v19 = vadd.f32 %v473_v17, %v438_v16  ;;  %v382_v20 = vadd.f32 %v481_v18, %v438_v16  ;;  %v253_v21 = vpop.f32.mrb[1].mxu0  ;;  %v285_v22 = vpop.f32.mrb[1].mxu1 }
 0x12c   :  { %v372_v23 = vadd.f32 %v438_v16, %v253_v21  ;;  %v380_v24 = vadd.f32 %v438_v16, %v285_v22  ;;  %v474_v25 = vpop.f32.mrb[2].mxu0  ;;  %v482_v26 = vpop.f32.mrb[2].mxu1 }
 0x12d   :  { %390 = vst [vmem:[#allocation9 + $0x10] sm:$0xff] %v374_v19  ;;  %398 = vst [vmem:[#allocation9 + $0x50] sm:$0xff] %v382_v20  ;;  %v375_v27 = vadd.f32 %v474_v25, %v438_v16  ;;  %v383_v28 = vadd.f32 %v482_v26, %v438_v16  ;;  %v256_v29 = vpop.f32.mrb[3].mxu0  ;;  %v288_v30 = vpop.f32.mrb[3].mxu1 }
 0x12e   :  { %388 = vst [vmem:[#allocation9] sm:$0xff] %v372_v23  ;;  %396 = vst [vmem:[#allocation9 + $0x40] sm:$0xff] %v380_v24  ;;  %v373_v31 = vadd.f32 %v438_v16, %v256_v29  ;;  %v381_v32 = vadd.f32 %v438_v16, %v288_v30 }
 0x12f   :  { %391 = vst [vmem:[#allocation9 + $0x18] sm:$0xff] %v375_v27  ;;  %399 = vst [vmem:[#allocation9 + $0x58] sm:$0xff] %v383_v28 }
 0x130   :  { %389 = vst [vmem:[#allocation9 + $0x8] sm:$0xff] %v373_v31  ;;  %397 = vst [vmem:[#allocation9 + $0x48] sm:$0xff] %v381_v32 }
 0x132   :  { %v477_v33 = vpop.f32.mrb[4].mxu0  ;;  %v485_v34 = vpop.f32.mrb[4].mxu1 }
 0x133   :  { %v378_v35 = vadd.f32 %v477_v33, %v438_v16  ;;  %v386_v36 = vadd.f32 %v485_v34, %v438_v16  ;;  %v269_v37 = vpop.f32.mrb[5].mxu0  ;;  %v301_v38 = vpop.f32.mrb[5].mxu1 }
 0x134   :  { %v376_v39 = vadd.f32 %v438_v16, %v269_v37  ;;  %v384_v40 = vadd.f32 %v438_v16, %v301_v38  ;;  %v478_v41 = vpop.f32.mrb[6].mxu0  ;;  %v486_v42 = vpop.f32.mrb[6].mxu1 }
 0x135   :  { %394 = vst [vmem:[#allocation9 + $0x30] sm:$0xff] %v378_v35  ;;  %402 = vst [vmem:[#allocation9 + $0x70] sm:$0xff] %v386_v36  ;;  %v379_v43 = vadd.f32 %v478_v41, %v438_v16  ;;  %v387_v44 = vadd.f32 %v486_v42, %v438_v16  ;;  %v272_v45 = vpop.f32.mrb[7].mxu0  ;;  %v304_v46 = vpop.f32.mrb[7].mxu1 }
 0x136   :  { %392 = vst [vmem:[#allocation9 + $0x20] sm:$0xff] %v376_v39  ;;  %400 = vst [vmem:[#allocation9 + $0x60] sm:$0xff] %v384_v40  ;;  %v377_v47 = vadd.f32 %v438_v16, %v272_v45  ;;  %v385_v48 = vadd.f32 %v438_v16, %v304_v46 }
 0x137   :  { %395 = vst [vmem:[#allocation9 + $0x38] sm:$0xff] %v379_v43  ;;  %403 = vst [vmem:[#allocation9 + $0x78] sm:$0xff] %v387_v44 }
 0x138   :  { %393 = vst [vmem:[#allocation9 + $0x28] sm:$0xff] %v377_v47  ;;  %401 = vst [vmem:[#allocation9 + $0x68] sm:$0xff] %v385_v48 }
 0x139   :  { %604 = shalt.err (!%p601_p0)
}
 0x13a   :  { %s605_s25 = scalar_lea.hbm %s707_s3, 2048 }
 0x13b   :  { %p606_p1 = scmp.ne.s32.totalorder %s707_s3, %s605_s25  ;;  %p609_p2 = scmp.lt.u32.totalorder %s605_s25, %s707_s3 }
 0x13d   :  { %p611_p3 = pnand %p609_p2, %p606_p1 }
 0x13f   :  { %614 = shalt.err (!%p611_p3)
}
 0x140   :  { %s627_s30 = smov 128   ;;  %s628_s4 = smov 8  }
 0x141   :  { %415 = dma.vmem_to_hbm [thread:$0]  %s410_s21, 2048, %s707_s3, [#allocation5], %s627_s30, %s627_s30, %s628_s4  }
 0x142   :  { %619 = dma.done.wait [#allocation5], 2048  }
 0x143   :  { %620 = vsyncadd [#allocation5], 4294965248 }
 0x144   :  { %419 = vsyncpa [#allocation4], 1 }
 0x145   :  { %420 = vsyncpa [#allocation7], 1 }
 0x146   :  { %421 = vsyncpa [#allocation5], 1 }

</bundles_post_ra>
